<compile_context>
chip_gen: v7x
topology: tpu7x:2x2x1
jax: 0.10.0
libtpu: 0.0.40
codegen_flags: <defaults>
</compile_context>

<pallas_src>
import jax
import jax.numpy as jnp
from jax.experimental import pallas as pl
from jax.experimental.pallas import tpu as pltpu

_LANE = 128
_TILE_BYTES = 1 << 20          # ~1 MiB per tile; in+out double-buffered ~= 4 MiB VMEM
_RAGGED_BLOCK_ELEMS = 32 * 1024  # conservative 1-D fallback block (multiple of 1024)


def _cathy_kernel(params_ref, x_ref, o_ref):
    # params_ref: SMEM (4,) float32 -> [A, B, k, b]
    A = params_ref[0]
    B = params_ref[1]
    k = params_ref[2]
    b = params_ref[3]
    # Upcast to f32 for the sin (mandatory on v5e, keeps accuracy everywhere);
    # cast back to the I/O dtype in-kernel so HBM traffic stays narrow.
    x = x_ref[...].astype(jnp.float32)
    o_ref[...] = (A * jnp.sin(k * x + b) + B).astype(o_ref.dtype)


def _round_up(v, m):
    return ((v + m - 1) // m) * m


def cathy_forward(x, A, B, k, b, *, donate_x=False):
    """Elementwise A*sin(k*x+b)+B. x: any shape; A,B,k,b: scalars / shape-(1,).

    Float inputs keep their dtype end-to-end; integer inputs return float32
    (cast happens inside the kernel, matching PyTorch type promotion).
    Set donate_x=True only if the caller no longer needs x (in-place update).
    """
    orig_shape = x.shape

    # dtype policy: keep HBM traffic in the input dtype; cast inside the kernel.
    if jnp.issubdtype(x.dtype, jnp.floating):
        in_dtype, out_dtype = x.dtype, x.dtype
    elif jnp.dtype(x.dtype).itemsize == 4:        # int32 / uint32: cast in-kernel
        in_dtype, out_dtype = x.dtype, jnp.float32
    else:                                         # rare sub-32-bit ints / bool
        x = x.astype(jnp.float32)
        in_dtype, out_dtype = jnp.float32, jnp.float32

    params = jnp.stack([
        jnp.asarray(A, jnp.float32).reshape(()),
        jnp.asarray(B, jnp.float32).reshape(()),
        jnp.asarray(k, jnp.float32).reshape(()),
        jnp.asarray(b, jnp.float32).reshape(()),
    ])

    flat = x.reshape(-1)                          # metadata-only under jit
    n = flat.shape[0]
    if n == 0:
        return flat.astype(out_dtype).reshape(orig_shape)

    in_isz = jnp.dtype(in_dtype).itemsize
    out_isz = jnp.dtype(out_dtype).itemsize
    itemsize = max(in_isz, out_isz)
    sub = 8 * (4 // min(in_isz, out_isz))         # native sublane packing: 8/16/32 rows

    # Alias x -> out only when shapes AND dtypes match (pure float pass-through).
    alias = {1: 0} if (donate_x and in_dtype == out_dtype) else {}

    compiler_params = pltpu.CompilerParams(
        # "parallel": lets the runtime shard tiles across TCs where supported.
        dimension_semantics=("parallel",),
    )

    if n % _LANE == 0:
        # ---- fast path: lane-dense (rows, 128) slab, dtype-scaled tiles ----
        rows = n // _LANE
        x2d = flat.reshape(rows, _LANE)
        tr = max(sub, min(_TILE_BYTES // (_LANE * itemsize), _round_up(rows, sub)))
        grid = (pl.cdiv(rows, tr),)

        out = pl.pallas_call(
            _cathy_kernel,
            out_shape=jax.ShapeDtypeStruct((rows, _LANE), out_dtype),
            grid_spec=pltpu.PrefetchScalarGridSpec(
                num_scalar_prefetch=0,
                grid=grid,
                in_specs=[
                    pl.BlockSpec(memory_space=pltpu.SMEM),          # params (4,)
                    pl.BlockSpec((tr, _LANE), lambda i: (i, 0)),    # x tile
                ],
                out_specs=pl.BlockSpec((tr, _LANE), lambda i: (i, 0)),
            ),
            compiler_params=compiler_params,
            input_output_aliases=alias,
        )(params, x2d)
        return out.reshape(orig_shape)

    # ---- ragged path: 1-D blocked, Pallas bounds the partial last block ----
    # No pad / slice / concat copies: the flat view goes straight to the kernel.
    blk = n if n <= _RAGGED_BLOCK_ELEMS else _RAGGED_BLOCK_ELEMS
    grid = (pl.cdiv(n, blk),)

    out = pl.pallas_call(
        _cathy_kernel,
        out_shape=jax.ShapeDtypeStruct((n,), out_dtype),
        grid_spec=pltpu.PrefetchScalarGridSpec(
            num_scalar_prefetch=0,
            grid=grid,
            in_specs=[
                pl.BlockSpec(memory_space=pltpu.SMEM),              # params (4,)
                pl.BlockSpec((blk,), lambda i: (i,)),               # x chunk
            ],
            out_specs=pl.BlockSpec((blk,), lambda i: (i,)),
        ),
        compiler_params=compiler_params,
        input_output_aliases=alias,
    )(params, flat)
    return out.reshape(orig_shape)


if __name__ == "__main__":
    key = jax.random.PRNGKey(0)
    kx, kA, kB, kk, kb = jax.random.split(key, 5)

    # Deterministic "randn"-style params, shape (1,) each, matching Cathy.__init__.
    A = jax.random.normal(kA, (1,), jnp.float32)
    B = jax.random.normal(kB, (1,), jnp.float32)
    k = jax.random.normal(kk, (1,), jnp.float32)
    b = jax.random.normal(kb, (1,), jnp.float32)

    def ref_fn(xv):
        return A[0] * jnp.sin(k[0] * xv.astype(jnp.float32) + b[0]) + B[0]

    # 1) f32 NCHW, lane-aligned (2*4*16*16 = 2048 = 16*128) -> 2-D fast path.
    x = jax.random.normal(kx, (2, 4, 16, 16), jnp.float32)
    out = jax.block_until_ready(cathy_forward(x, A, B, k, b))
    assert out.shape == x.shape and out.dtype == x.dtype
    assert jnp.allclose(out, ref_fn(x), atol=1e-5, rtol=1e-5)

    # 2) bf16: HBM traffic stays bf16; tile rows scale with dtype (16-row sublanes).
    x_bf16 = x.astype(jnp.bfloat16)
    out_bf16 = jax.block_until_ready(cathy_forward(x_bf16, A, B, k, b))
    assert out_bf16.dtype == jnp.bfloat16
    assert jnp.allclose(out_bf16.astype(jnp.float32), ref_fn(x_bf16),
                        atol=2e-2, rtol=2e-2)

    # 3) Ragged (3*5*7 = 105, not a multiple of 128) -> copy-free 1-D path.
    x_odd = jax.random.normal(kx, (3, 5, 7), jnp.float32)
    out_odd = jax.block_until_ready(cathy_forward(x_odd, A, B, k, b))
    assert out_odd.shape == x_odd.shape
    assert jnp.allclose(out_odd, ref_fn(x_odd), atol=1e-5, rtol=1e-5)

    # 4) Donated input (in-place friendly elementwise): x buffer aliased to output.
    x_don = jax.random.normal(kb, (4, 8, 32), jnp.float32)   # 1024 elems, aligned
    ref_don = ref_fn(x_don)                                   # compute ref BEFORE donating
    out_don = jax.block_until_ready(cathy_forward(x_don, A, B, k, b, donate_x=True))
    assert out_don.shape == x_don.shape
    assert jnp.allclose(out_don, ref_don, atol=1e-5, rtol=1e-5)

    print("KERNEL_OK")
</pallas_src>

<mosaic_0001>
module attributes {stable_mosaic.version = 11 : i64} {
  func.func @_cathy_kernel(%arg0: i32, %arg1: memref<4xf32, #tpu.memory_space<smem>>, %arg2: memref<16x128xf32, #tpu.memory_space<vmem>>, %arg3: memref<16x128xf32, #tpu.memory_space<vmem>>) attributes {dimension_semantics = [#tpu.dimension_semantics<parallel>], iteration_bounds = array<i64: 1>, scalar_prefetch = 0 : i64, scratch_operands = 0 : i64, tpu.core_type = #tpu.core_type<tc>, window_params = [{transform_indices = @transform_0, window_bounds = array<i64: 4>}, {transform_indices = @transform_1, window_bounds = array<i64: 16, 128>}, {transform_indices = @transform_2, window_bounds = array<i64: 16, 128>}]} {
    %c0 = arith.constant 0 : index
    %0 = memref.load %arg1[%c0] : memref<4xf32, #tpu.memory_space<smem>>
    %c1 = arith.constant 1 : index
    %1 = memref.load %arg1[%c1] : memref<4xf32, #tpu.memory_space<smem>>
    %c2 = arith.constant 2 : index
    %2 = memref.load %arg1[%c2] : memref<4xf32, #tpu.memory_space<smem>>
    %c3 = arith.constant 3 : index
    %3 = memref.load %arg1[%c3] : memref<4xf32, #tpu.memory_space<smem>>
    %c0_0 = arith.constant 0 : index
    %c0_1 = arith.constant 0 : index
    %4 = vector.load %arg2[%c0_0, %c0_1] : memref<16x128xf32, #tpu.memory_space<vmem>>, vector<16x128xf32>
    %5 = vector.broadcast %2 : f32 to vector<16x128xf32>
    %6 = arith.mulf %5, %4 : vector<16x128xf32>
    %7 = vector.broadcast %3 : f32 to vector<16x128xf32>
    %8 = arith.addf %6, %7 : vector<16x128xf32>
    %9 = math.sin %8 : vector<16x128xf32>
    %10 = vector.broadcast %0 : f32 to vector<16x128xf32>
    %11 = arith.mulf %10, %9 : vector<16x128xf32>
    %12 = vector.broadcast %1 : f32 to vector<16x128xf32>
    %13 = arith.addf %11, %12 : vector<16x128xf32>
    %c0_2 = arith.constant 0 : index
    %c0_3 = arith.constant 0 : index
    %14 = vector.load %arg3[%c0_2, %c0_3] : memref<16x128xf32, #tpu.memory_space<vmem>>, vector<16x128xf32>
    tpu.vector_store %arg3[%c0_2, %c0_3], %13 {strides = array<i32>} : memref<16x128xf32, #tpu.memory_space<vmem>>, vector<16x128xf32>,
    return
  }
  func.func @transform_0(%arg0: i32) -> i32 {
    %c0_i32 = arith.constant 0 : i32
    %c0_i32_0 = arith.constant 0 : i32
    return %c0_i32 : i32
  }
  func.func @transform_1(%arg0: i32) -> (i32, i32) {
    %c0_i32 = arith.constant 0 : i32
    %c0_i32_0 = arith.constant 0 : i32
    return %arg0, %c0_i32 : i32, i32
  }
  func.func @transform_2(%arg0: i32) -> (i32, i32) {
    %c0_i32 = arith.constant 0 : i32
    %c0_i32_0 = arith.constant 0 : i32
    return %arg0, %c0_i32 : i32, i32
  }
}

</mosaic_0001>

<bundles_post_ra>
// kernel: tpu_custom_call.1
= control target key start
LH: loop header
LB: loop body
LE: loop exit
PB: predicated region body
PF: predicated region fallthrough
CT: control target
= control target key end

     0   :  { %7 = vsyncpa [#allocation5], 0  ;;  %s533_s0 = inlined_call_operand.hbm [shape: f32[4], index: 0, kind: input, shape index: {}]   ;;  %s534_s1 = inlined_call_operand.hbm [shape: f32[16,128], index: 1, kind: input, shape index: {}]   ;;  %s535_s2 = inlined_call_operand.hbm [shape: f32[16,128], index: 2, kind: output, shape index: {}]  }
   0x1   :  { %8 = vsyncpa [#allocation3], 0 }
   0x2   :  { %9 = vsyncpa [#allocation4], 0  ;;  %s321_s11 = scalar_lea.hbm %s533_s0, 16 }
   0x3   :  { %p322_p0 = scmp.ne.s32.totalorder %s533_s0, %s321_s11  ;;  %p325_p1 = scmp.lt.u32.totalorder %s321_s11, %s533_s0 }
   0x5   :  { %p327_p2 = pnand %p325_p1, %p322_p0 }
   0x7   :  { %330 = shalt.err (!%p327_p2)
}
   0x8   :  { %s381_s16 = smov [#allocation2]   ;;  %s382_s19 = smov [#allocation6]  }
   0x9   :  { %17 = dma.hbm_to_smem %s533_s0, 16, %s381_s16, [#allocation5]  }
   0xa   :  { %s23_s20 = sshll.u32 %s382_s19, 4  ;;  %s331_s23 = scalar_lea.hbm %s534_s1, 256  ;;  %s24_s20 = int_to_ptr.vmem [resolvable:$true] %s23_s20 }
   0xb   :  { %p332_p3 = scmp.ne.s32.totalorder %s534_s1, %s331_s23  ;;  %p335_p4 = scmp.lt.u32.totalorder %s331_s23, %s534_s1 }
   0xd   :  { %p337_p5 = pnand %p335_p4, %p332_p3 }
   0xf   :  { %340 = shalt.err (!%p337_p5)
}
  0x10   :  { %s341_s28 = scalar_lea.vmem %s24_s20, 256  ;;  %p346_p7 = scmp.lt.s32.totalorder %s24_s20, %s24_s20 }
  0x11   :  { %p342_p6 = scmp.ne.s32.totalorder %s24_s20, %s341_s28  ;;  %p347_p8 = scmp.lt.s32.totalorder %s341_s28, %s341_s28 }
  0x13   :  { %p348_p9 = por %p347_p8, %p346_p7 }
  0x15   :  { %p349_p10 = pnand %p348_p9, %p342_p6 }
  0x17   :  { %352 = shalt.err (!%p349_p10)
}
  0x18   :  { %s383_s0 = smov 128   ;;  %s384_s29 = smov 8  }
  0x19   :  { %29 = dma.hbm_to_vmem [thread:$0]  %s534_s1, 256, %s24_s20, [#allocation3], %s383_s0, %s383_s0, %s384_s29  }
  0x1a   :  { %375 = dma.done.wait [#allocation5], 16  }
  0x1b   :  { %376 = vsyncadd [#allocation5], 4294967280 }
  0x1c   :  { %377 = dma.done.wait [#allocation3], 256  }
  0x1d   :  { %378 = vsyncadd [#allocation3], 4294967040 }
  0x1e   :  { %36 = sfence }
  0x1f   :  { %s284_s4 = sld [smem:[#allocation2 + $0x2]]  ;;  %s285_s5 = sld [smem:[#allocation2 + $0x3]]  ;;  %v41_v0 = vld [vmem:[#allocation6] sm:$0xff]  ;;  %v42_v1 = vld [vmem:[#allocation6 + $0x8] sm:$0xff]  ;;  %v385_v30 = vmov 683565275  }
  0x20   :  { %v386_v32 = vmov 2475754826   ;;  %v387_v34 = vmov 2131351028   ;;  %v388_v36 = vmov 2102212464  }
  0x21   :  { %v389_v38 = vmov 920167782   ;;  %v390_v46 = vmov 1326507024   ;;  %s505_s1 = sld [smem:[#allocation2]]  ;;  %s507_s6 = sld [smem:[#allocation2 + $0x1]] }
  0x22   :  { %s391_s7 = smov [#allocation7]  }
  0x23   :  { %s270_s8 = sshll.u32 %s391_s7, 4  ;;  %s271_s8 = int_to_ptr.vmem [resolvable:$true] %s270_s8 }
  0x24   :  { %s353_s9 = scalar_lea.vmem %s271_s8, 256  ;;  %p358_p12 = scmp.lt.s32.totalorder %s271_s8, %s271_s8 }
  0x25   :  { %v43_v2 = vstv %s284_s4  ;;  %v46_v3 = vstv %s285_s5  ;;  %p354_p11 = scmp.ne.s32.totalorder %s271_s8, %s353_s9  ;;  %p359_p13 = scmp.lt.s32.totalorder %s353_s9, %s353_s9 }
  0x26   :  { %v44_v4 = vmul.f32 %v43_v2, %v41_v0  ;;  %v45_v5 = vmul.f32 %v43_v2, %v42_v1 }
  0x27   :  { %p360_p0 = por %p359_p13, %p358_p12 }
  0x28   :  { %v434_v6 = vadd.f32 %v46_v3, %v44_v4  ;;  %v436_v7 = vadd.f32 %v46_v3, %v45_v5 }
  0x29   :  { %p361_p1 = pnand %p360_p0, %p354_p11 }
  0x2a   :  { %v49_v8 = vand.u32 2147483647, %v434_v6  ;;  %v52_v9 = vand.u32 2139095040, %v434_v6  ;;  %v153_v10 = vand.u32 2147483647, %v436_v7  ;;  %v156_v11 = vand.u32 2139095040, %v436_v7 }
  0x2b   :  { %vm51_vm14 = vcmp.lt.s32.totalorder %v434_v6, 0 }
  0x2c   :  { %v53_v12 = vshrl.u32 %v52_v9, 23  ;;  %v56_v13 = vand.u32 8388607, %v49_v8  ;;  %v157_v14 = vshrl.u32 %v156_v11, 23  ;;  %v160_v15 = vand.u32 8388607, %v153_v10 }
  0x2d   :  { %vm50_vm15 = vcmp.le.f32.partialorder %v49_v8, 0.7853982 }
  0x2e   :  { %v286_v16 = vadd.s32 4294967169, %v53_v12  ;;  %v290_v17 = vadd.s32 4294967169, %v157_v14  ;;  %v57_v19 = vor.u32 8388608, %v56_v13  ;;  %v161_v20 = vor.u32 8388608, %v160_v15 }
  0x30   :  { %v59_v18 = vadd.s32 1, %v286_v16  ;;  %v163_v21 = vadd.s32 1, %v290_v17  ;;  %v446_v26 = vshll.u32 %v57_v19, 8  ;;  %v448_v28 = vshll.u32 %v161_v20, 8 }
  0x32   :  { %vm60_vm0 = vcmp.gt.s32.totalorder %v59_v18, 0  ;;  %vm164_vm1 = vcmp.gt.s32.totalorder %v163_v21, 0 }
  0x33   :  { %v61_v22 = vsel %vm60_vm0, %v59_v18, 0  ;;  %v165_v25 = vsel %vm164_vm1, %v163_v21, 0  ;;  %vm155_vm0 = vcmp.lt.s32.totalorder %v436_v7, 0  ;;  %vm501_vm1 = vcmp.le.f32.partialorder %v153_v10, 0.7853982 }
  0x34   :  { %v62_v23 = vshrl.u32 %v61_v22, 5  ;;  %v63_v24 = vand.u32 31, %v61_v22  ;;  %v167_v27 = vand.u32 31, %v165_v25  ;;  %v450_v40 = vshrl.u32 %v165_v25, 5 }
  0x36   :  { %v64_v29 = vsub.s32 32, %v63_v24  ;;  %v66_v31 = vshll.u32 %v385_v30, %v63_v24  ;;  %v69_v33 = vshll.u32 %v386_v32, %v63_v24  ;;  %v72_v35 = vshll.u32 %v387_v34, %v63_v24 }
  0x37   :  { %v75_v37 = vshll.u32 %v388_v36, %v63_v24  ;;  %v78_v39 = vshll.u32 %v389_v38, %v63_v24  ;;  %vm81_vm2 = vcmp.lt.s32.totalorder %v62_v23, 1  ;;  %vm82_vm3 = vcmp.lt.s32.totalorder %v62_v23, 2 }
  0x38   :  { %v65_v41 = vshrl.u32 %v385_v30, %v64_v29  ;;  %v67_v42 = vshrl.u32 %v386_v32, %v64_v29  ;;  %v70_v43 = vshrl.u32 %v387_v34, %v64_v29  ;;  %v73_v44 = vshrl.u32 %v388_v36, %v64_v29 }
  0x39   :  { %v76_v45 = vshrl.u32 %v389_v38, %v64_v29  ;;  %v79_v47 = vshrl.u32 %v390_v46, %v64_v29  ;;  %vm84_vm4 = vcmp.lt.s32.totalorder %v62_v23, 4  ;;  %v168_v51 = vsub.s32 32, %v167_v27 }
  0x3a   :  { %v68_v48 = vor.u32 %v67_v42, %v66_v31  ;;  %v71_v49 = vor.u32 %v70_v43, %v69_v33  ;;  %v74_v50 = vor.u32 %v73_v44, %v72_v35  ;;  %vm83_vm5 = vcmp.lt.s32.totalorder %v62_v23, 3 }
  0x3b   :  { %v77_v52 = vor.u32 %v76_v45, %v75_v37  ;;  %v80_v53 = vor.u32 %v79_v47, %v78_v39  ;;  %v170_v54 = vshll.u32 %v385_v30, %v167_v27  ;;  %v173_v62 = vshll.u32 %v386_v32, %v167_v27 }
  0x3c   :  { %v85_v55 = vsel %vm81_vm2, %v65_v41, %v68_v48  ;;  %v86_v56 = vsel %vm84_vm4, %v74_v50, 2102212464  ;;  %v89_v57 = vsel %vm81_vm2, %v68_v48, %v71_v49  ;;  %v93_v58 = vsel %vm81_vm2, %v71_v49, %v74_v50 }
  0x3d   :  { %v87_v59 = vsel %vm83_vm5, %v71_v49, %v86_v56  ;;  %v90_v60 = vsel %vm84_vm4, %v77_v52, 920167782  ;;  %v94_v61 = vsel %vm84_vm4, %v80_v53, 1326507024  ;;  %v169_v1 = vshrl.u32 %v385_v30, %v168_v51 }
  0x3e   :  { %v91_v63 = vsel %vm83_vm5, %v74_v50, %v90_v60  ;;  %v95_v0 = vsel %vm83_vm5, %v77_v52, %v94_v61  ;;  %v171_v2 = vshrl.u32 %v386_v32, %v168_v51  ;;  %v88_v3 = vsel %vm82_vm3, %v85_v55, %v87_v59 }
  0x3f   :  { %v92_v4 = vsel %vm82_vm3, %v89_v57, %v91_v63  ;;  %v96_v5 = vsel %vm82_vm3, %v93_v58, %v95_v0  ;;  %v174_v9 = vshrl.u32 %v387_v34, %v168_v51  ;;  %v176_v17 = vshll.u32 %v387_v34, %v167_v27 }
  0x40   :  { %v459_v11 = vmul.u32.u64.low %v446_v26, %v96_v5  ;;  %v460_v12 = vmul.u32.u64.high %v446_v26, %v96_v5, %v459_v11  ;;  %v463_v13 = vmul.u32.u64.low %v446_v26, %v92_v4  ;;  %v464_v14 = vmul.u32.u64.high %v446_v26, %v92_v4, %v463_v13 }
  0x41   :  { %v172_v15 = vor.u32 %v171_v2, %v170_v54  ;;  %v175_v16 = vor.u32 %v174_v9, %v173_v62  ;;  %v177_v18 = vshrl.u32 %v388_v36, %v168_v51  ;;  %v179_v19 = vshll.u32 %v388_v36, %v167_v27 }
  0x42   :  { %v180_v20 = vshrl.u32 %v389_v38, %v168_v51  ;;  %v182_v21 = vshll.u32 %v389_v38, %v167_v27  ;;  %v183_v22 = vshrl.u32 %v390_v46, %v168_v51  ;;  %v104_v23 = vmul.u32 %v446_v26, %v88_v3 }
  0x43   :  { %v178_v24 = vor.u32 %v177_v18, %v176_v17  ;;  %vm185_vm6 = vcmp.lt.s32.totalorder %v450_v40, 1  ;;  %vm186_vm7 = vcmp.lt.s32.totalorder %v450_v40, 2  ;;  %vm106_vm8 = vc.u32 %v460_v12, %v463_v13 }
  0x44   :  { %v107_v25 = vadd.s32 1, %v464_v14  ;;  %v181_v29 = vor.u32 %v180_v20, %v179_v19  ;;  %vm187_vm9 = vcmp.lt.s32.totalorder %v450_v40, 3  ;;  %v184_v30 = vor.u32 %v183_v22, %v182_v21 }
  0x45   :  { %vm188_vm10 = vcmp.lt.s32.totalorder %v450_v40, 4  ;;  %v189_v31 = vsel %vm185_vm6, %v169_v1, %v172_v15  ;;  %v193_v27 = vsel %vm185_vm6, %v172_v15, %v175_v16  ;;  %v197_v34 = vsel %vm185_vm6, %v175_v16, %v178_v24 }
  0x46   :  { %v108_v32 = vsel %vm106_vm8, %v107_v25, %v464_v14  ;;  %v190_v26 = vsel %vm188_vm10, %v178_v24, 2102212464  ;;  %v194_v33 = vsel %vm188_vm10, %v181_v29, 920167782  ;;  %v198_v38 = vsel %vm188_vm10, %v184_v30, 1326507024 }
  0x47   :  { %v109_v35 = vadd.s32 %v108_v32, %v104_v23  ;;  %v191_v36 = vsel %vm187_vm9, %v175_v16, %v190_v26  ;;  %v195_v37 = vsel %vm187_vm9, %v178_v24, %v194_v33  ;;  %v199_v42 = vsel %vm187_vm9, %v181_v29, %v198_v38 }
  0x48   :  { %v192_v39 = vsel %vm186_vm7, %v189_v31, %v191_v36  ;;  %v196_v41 = vsel %vm186_vm7, %v193_v27, %v195_v37  ;;  %v200_v44 = vsel %vm186_vm7, %v197_v34, %v199_v42  ;;  %v105_v63 = vadd.s32 %v463_v13, %v460_v12 }
  0x49   :  { %v110_v43 = vadd.s32 536870912, %v109_v35  ;;  %v481_v45 = vmul.u32.u64.low %v448_v28, %v196_v41  ;;  %v482_v46 = vmul.u32.u64.high %v448_v28, %v196_v41, %v481_v45  ;;  %v208_v50 = vmul.u32 %v448_v28, %v192_v39 }
  0x4a   :  { %v485_v47 = vmul.u32.u64.low %v448_v28, %v200_v44  ;;  %v486_v48 = vmul.u32.u64.high %v448_v28, %v200_v44, %v485_v47  ;;  %vm141_vm5 = vweird.f32 %v434_v6  ;;  %vm245_vm9 = vweird.f32 %v436_v7 }
  0x4b   :  { %v111_v49 = vshrl.u32 %v110_v43, 30  ;;  %v211_v52 = vadd.s32 1, %v482_v46 }
  0x4c   :  { %vm210_vm11 = vc.u32 %v486_v48, %v481_v45  ;;  %v209_v19 = vadd.s32 %v481_v45, %v486_v48 }
  0x4d   :  { %v112_v51 = vshll.u32 %v111_v49, 30  ;;  %v212_v40 = vsel %vm210_vm11, %v211_v52, %v482_v46  ;;  %v135_v12 = vsub.s32 4, %v111_v49 }
  0x4e   :  { %v213_v54 = vadd.s32 %v212_v40, %v208_v50  ;;  %v257_v40 = vstv %s505_s1 }
  0x4f   :  { %v113_v53 = vsub.s32 %v109_v35, %v112_v51  ;;  %v136_v31 = vsel %vm51_vm14, %v135_v12, %v111_v49 }
  0x50   :  { %v214_v56 = vadd.s32 536870912, %v213_v54  ;;  %v138_v34 = vsel %vm50_vm15, 0, %v136_v31 }
  0x51   :  { %v115_v55 = vsub.s32 0, %v113_v53  ;;  %v142_v39 = vadd.s32 3, %v138_v34 }
  0x52   :  { %v215_v58 = vshrl.u32 %v214_v56, 30 }
  0x53   :  { %v287_v57 = vmin.u32 %v115_v55, %v113_v53  ;;  %v143_v44 = vand.u32 3, %v142_v39 }
  0x54   :  { %v216_v60 = vshll.u32 %v215_v58, 30  ;;  %v239_v38 = vsub.s32 4, %v215_v58 }
  0x55   :  { %v117_v59 = vclz %v287_v57  ;;  %vm148_vm2 = vcmp.eq.s32.totalorder %v143_v44, 2  ;;  %vm145_vm3 = vcmp.eq.s32.totalorder %v143_v44, 0  ;;  %vm144_vm4 = vcmp.lt.s32.totalorder %v143_v44, 2 }
  0x56   :  { %v217_v62 = vsub.s32 %v213_v54, %v216_v60  ;;  %v240_v43 = vsel %vm155_vm0, %v239_v38, %v215_v58  ;;  %v260_v57 = vstv %s507_s6 }
  0x57   :  { %v288_v61 = vadd.s32 4294967294, %v117_v59  ;;  %v242_v47 = vsel %vm501_vm1, 0, %v240_v43 }
  0x58   :  { %v219_v0 = vsub.s32 0, %v217_v62  ;;  %v246_v50 = vadd.s32 3, %v242_v47 }
  0x59   :  { %vm289_vm12 = vcmp.lt.s32.totalorder %v288_v61, 0 }
  0x5a   :  { %v120_v28 = vsel %vm289_vm12, 0, %v288_v61  ;;  %v291_v4 = vmin.u32 %v219_v0, %v217_v62  ;;  %v247_v55 = vand.u32 3, %v246_v50 }
  0x5b   :  { %v121_v1 = vsub.s32 32, %v120_v28  ;;  %v122_v2 = vshll.u32 %v113_v53, %v120_v28  ;;  %v125_v3 = vsub.s32 4294967266, %v120_v28 }
  0x5c   :  { %v221_v11 = vclz %v291_v4  ;;  %vm252_vm6 = vcmp.eq.s32.totalorder %v247_v55, 2  ;;  %vm249_vm7 = vcmp.eq.s32.totalorder %v247_v55, 0  ;;  %vm248_vm8 = vcmp.lt.s32.totalorder %v247_v55, 2 }
  0x5d   :  { %v123_v5 = vshrl.u32 %v105_v63, %v121_v1  ;;  %v126_v9 = vadd.s32 127, %v125_v3 }
  0x5e   :  { %v292_v16 = vadd.s32 4294967294, %v221_v11 }
  0x5f   :  { %v124_v14 = vor.u32 %v123_v5, %v122_v2  ;;  %v127_v15 = vshll.u32 %v126_v9, 23 }
  0x60   :  { %vm293_vm13 = vcmp.lt.s32.totalorder %v292_v16, 0 }
  0x61   :  { %v128_v17 = vor.u32 4788187, %v127_v15  ;;  %v131_v18 = vcvt.s32.f32 %v124_v14  ;;  %v224_v13 = vsel %vm293_vm13, 0, %v292_v16 }
  0x62   :  { %v225_v21 = vsub.s32 32, %v224_v13  ;;  %v226_v22 = vshll.u32 %v217_v62, %v224_v13  ;;  %v229_v23 = vsub.s32 4294967266, %v224_v13 }
  0x63   :  { %v129_v20 = vand.u32 2147483647, %v128_v17 }
  0x64   :  { %v227_v25 = vshrl.u32 %v209_v19, %v225_v21  ;;  %v230_v29 = vadd.s32 127, %v229_v23 }
  0x65   :  { %v132_v24 = vmul.f32 %v131_v18, %v129_v20 }
  0x66   :  { %v228_v27 = vor.u32 %v227_v25, %v226_v22  ;;  %v231_v32 = vshll.u32 %v230_v29, 23 }
  0x67   :  { %v133_v30 = vxor.u32 2147483648, %v132_v24 }
  0x68   :  { %v232_v35 = vor.u32 4788187, %v231_v32  ;;  %v235_v36 = vcvt.s32.f32 %v228_v27 }
  0x69   :  { %v134_v26 = vsel %vm51_vm14, %v133_v30, %v132_v24 }
  0x6a   :  { %v137_v33 = vsel %vm50_vm15, %v434_v6, %v134_v26  ;;  %v233_v37 = vand.u32 2147483647, %v232_v35 }
  0x6b   :  { %313 = vcosq.f32 %v137_v33 }
  0x6c   :  { %315 = vsinq.f32 %v137_v33  ;;  %v236_v41 = vmul.f32 %v235_v36, %v233_v37 }
  0x6e   :  { %v237_v42 = vxor.u32 2147483648, %v236_v41 }
  0x70   :  { %v238_v45 = vsel %vm155_vm0, %v237_v42, %v236_v41 }
  0x71   :  { %v241_v46 = vsel %vm501_vm1, %v436_v7, %v238_v45 }
  0x72   :  { %317 = vcosq.f32 %v241_v46 }
  0x73   :  { %319 = vsinq.f32 %v241_v46 }
  0x75   :  { %v314_v10 = vpop.eup %313 }
  0x76   :  { %v316_v48 = vpop.eup %315  ;;  %v149_v49 = vxor.u32 2147483648, %v314_v10 }
  0x77   :  { %v146_v51 = vxor.u32 2147483648, %v316_v48 }
  0x78   :  { %v150_v52 = vsel %vm148_vm2, %v149_v49, %v316_v48 }
  0x79   :  { %v147_v53 = vsel %vm145_vm3, %v314_v10, %v146_v51 }
  0x7a   :  { %v151_v54 = vsel %vm144_vm4, %v147_v53, %v150_v52 }
  0x7b   :  { %v152_v56 = vsel %vm141_vm5, nan, %v151_v54 }
  0x7c   :  { %v258_v58 = vmul.f32 %v257_v40, %v152_v56  ;;  %v318_v59 = vpop.eup %317 }
  0x7d   :  { %v320_v61 = vpop.eup %319  ;;  %v253_v62 = vxor.u32 2147483648, %v318_v59 }
  0x7e   :  { %v261_v60 = vadd.f32 %v260_v57, %v258_v58  ;;  %v250_v63 = vxor.u32 2147483648, %v320_v61 }
  0x7f   :  { %v254_v6 = vsel %vm252_vm6, %v253_v62, %v320_v61 }
  0x80   :  { %263 = vst [vmem:[#allocation7] sm:$0xff] %v261_v60  ;;  %v251_v28 = vsel %vm249_vm7, %v318_v59, %v250_v63 }
  0x81   :  { %v255_v0 = vsel %vm248_vm8, %v251_v28, %v254_v6 }
  0x82   :  { %v256_v1 = vsel %vm245_vm9, nan, %v255_v0 }
  0x83   :  { %v259_v2 = vmul.f32 %v257_v40, %v256_v1 }
  0x85   :  { %v262_v3 = vadd.f32 %v260_v57, %v259_v2 }
  0x87   :  { %264 = vst [vmem:[#allocation7 + $0x8] sm:$0xff] %v262_v3 }
  0x88   :  { %364 = shalt.err (!%p361_p1)
}
  0x89   :  { %s365_s12 = scalar_lea.hbm %s535_s2, 256 }
  0x8a   :  { %p366_p2 = scmp.ne.s32.totalorder %s535_s2, %s365_s12  ;;  %p369_p3 = scmp.lt.u32.totalorder %s365_s12, %s535_s2 }
  0x8c   :  { %p371_p4 = pnand %p369_p3, %p366_p2 }
  0x8e   :  { %374 = shalt.err (!%p371_p4)
}
  0x8f   :  { %276 = dma.vmem_to_hbm [thread:$0]  %s271_s8, 256, %s535_s2, [#allocation4], %s383_s0, %s383_s0, %s384_s29  }
  0x90   :  { %379 = dma.done.wait [#allocation4], 256  }
  0x91   :  { %380 = vsyncadd [#allocation4], 4294967040 }
  0x92   :  { %280 = vsyncpa [#allocation3], 1 }
  0x93   :  { %281 = vsyncpa [#allocation4], 1 }
  0x94   :  { %282 = vsyncpa [#allocation5], 1 }

</bundles_post_ra>
